<compile_context>
chip_gen: v7x
topology: tpu7x:2x2x1
jax: 0.10.0
libtpu: 0.0.40
codegen_flags: <defaults>
</compile_context>

<pallas_src>
import jax
import jax.numpy as jnp
from jax.experimental import pallas as pl
from jax.experimental.pallas import tpu as pltpu


def _round_up(x: int, m: int) -> int:
    return (x + m - 1) // m * m


def _cdiv(a: int, b: int) -> int:
    return (a + b - 1) // b


def _linear_probe_kernel(x_ref, w_ref, b_ref, o_ref):
    # x_ref: (TM, D) native dtype, w_ref: (1, D) f32, b_ref: (1, 1) f32,
    # o_ref: (TM, 1) f32.
    # Upcast in-kernel (bf16 streaming path), f32 accumulate on the VPU/XLU.
    x = x_ref[...].astype(jnp.float32)
    prod = x * w_ref[...]                                  # (TM, D) f32
    o_ref[...] = (
        jnp.sum(prod, axis=-1, keepdims=True) + b_ref[...]
    ).astype(o_ref.dtype)


def binary_dependency_probe(
    embeddings,
    weight,
    bias,
    *,
    tm: int | None = None,
    target_tile_bytes: int = 6 * 1024 * 1024,
    vmem_budget_bytes: int = 24 * 1024 * 1024,
):
    """embeddings: (B, S, D) any float dtype; weight: (1, D) or (D, 1) f32;
    bias: (1,) f32  ->  logits (B, S, 1) f32."""
    B, S, D = embeddings.shape
    M = B * S

    x_dtype = embeddings.dtype
    itemsize = jnp.dtype(x_dtype).itemsize
    # Sublane alignment so packed dtypes (bf16/int8) don't trigger relayouts.
    sublane = {4: 8, 2: 16, 1: 32}.get(itemsize, 8)

    # --- choose the row tile -------------------------------------------------
    # VMEM footprint per row, including lane padding:
    #   input  : double-buffered, D padded up to a multiple of 128 lanes
    #   output : double-buffered (tm, 1) f32 block, lane-padded to 128
    lane_d = _round_up(D, 128)
    vmem_per_row = 2 * lane_d * itemsize + 2 * 128 * 4
    tm_cap = max(sublane, vmem_budget_bytes // vmem_per_row)

    if tm is None:
        # Bytes-targeted tile: ~target_tile_bytes of *actual* HBM read traffic
        # per grid step, regardless of D.
        tm = max(sublane, target_tile_bytes // max(D * itemsize, 1))

    tm_eff = min(tm, tm_cap, _round_up(M, sublane))
    # v7x megacore: guarantee >= 2 grid steps (both TensorCores get work)
    # whenever there is enough work to split.
    if M > 2 * sublane:
        tm_eff = min(tm_eff, _round_up(_cdiv(M, 2), sublane))
    tm_eff = max(sublane, (tm_eff // sublane) * sublane)

    grid = _cdiv(M, tm_eff)          # partial last block handled by Pallas

    x2d = embeddings.reshape(M, D)                    # free reshape, native dtype
    w_row = weight.reshape(1, D).astype(jnp.float32)  # lane-dense resident weight
    b2d = bias.reshape(1, 1).astype(jnp.float32)

    out = pl.pallas_call(
        _linear_probe_kernel,
        out_shape=jax.ShapeDtypeStruct((M, 1), jnp.float32),
        grid_spec=pltpu.PrefetchScalarGridSpec(
            num_scalar_prefetch=0,
            grid=(grid,),
            in_specs=[
                pl.BlockSpec((tm_eff, D), lambda i: (i, 0)),  # streaming rows
                pl.BlockSpec((1, D), lambda i: (0, 0)),       # resident weight
                pl.BlockSpec((1, 1), lambda i: (0, 0)),       # bias
            ],
            out_specs=pl.BlockSpec((tm_eff, 1), lambda i: (i, 0)),
        ),
        compiler_params=pltpu.CompilerParams(
            dimension_semantics=("parallel",),   # shard M-grid across TCs (v7x)
            vmem_limit_bytes=32 * 1024 * 1024,   # explicit: load-bearing on v5e,
                                                 # safe on v7x (64 MiB/TC physical)
        ),
        cost_estimate=pl.CostEstimate(
            flops=2 * M * D,
            transcendentals=0,
            bytes_accessed=M * D * itemsize + D * 4 + M * 4,
        ),
    )(x2d, w_row, b2d)

    return out.reshape(B, S, 1)


def init_params(key, input_dim):
    """Deterministic init matching nn.Linear(input_dim, 1) default scheme."""
    kw, kb = jax.random.split(key)
    bound = 1.0 / jnp.sqrt(jnp.float32(input_dim))
    weight = jax.random.uniform(kw, (1, input_dim), jnp.float32, -bound, bound)
    bias = jax.random.uniform(kb, (1,), jnp.float32, -bound, bound)
    return weight, bias


def _reference(embeddings, weight, bias):
    # Row-wise f32 multiply-accumulate; matches nn.Linear forward numerics.
    x = embeddings.astype(jnp.float32)
    w = weight.reshape(1, 1, -1).astype(jnp.float32)
    return (x * w).sum(-1, keepdims=True) + bias.astype(jnp.float32)


if __name__ == "__main__":
    key = jax.random.PRNGKey(0)
    k_x, k_p = jax.random.split(key)

    # --- small f32 case ------------------------------------------------------
    batch, seq, input_dim = 2, 8, 32
    embeddings = jax.random.normal(k_x, (batch, seq, input_dim), jnp.float32)
    weight, bias = init_params(k_p, input_dim)

    logits = binary_dependency_probe(embeddings, weight, bias)
    jax.block_until_ready(logits)

    ref = _reference(embeddings, weight, bias)
    assert logits.shape == (batch, seq, 1)
    assert jnp.allclose(logits, ref, atol=1e-5, rtol=1e-5)

    # --- bf16 streaming + uneven row count (multi-tile, partial last block) --
    b2, s2, d2 = 3, 37, 128
    emb2 = jax.random.normal(
        jax.random.PRNGKey(1), (b2, s2, d2), jnp.float32
    ).astype(jnp.bfloat16)
    w2, bi2 = init_params(jax.random.PRNGKey(2), d2)
    out2 = binary_dependency_probe(emb2, w2, bi2, tm=64)
    jax.block_until_ready(out2)
    ref2 = _reference(emb2, w2, bi2)
    assert out2.shape == (b2, s2, 1)
    assert jnp.allclose(out2, ref2, atol=1e-3, rtol=1e-3)

    print("KERNEL_OK")
</pallas_src>

<mosaic_0001>
module attributes {stable_mosaic.version = 11 : i64} {
  func.func @_linear_probe_kernel(%arg0: i32, %arg1: memref<16x32xf32, #tpu.memory_space<vmem>>, %arg2: memref<1x32xf32, #tpu.memory_space<vmem>>, %arg3: memref<1x1xf32, #tpu.memory_space<vmem>>, %arg4: memref<16x1xf32, #tpu.memory_space<vmem>>) attributes {dimension_semantics = [#tpu.dimension_semantics<parallel>], iteration_bounds = array<i64: 1>, scalar_prefetch = 0 : i64, scratch_operands = 0 : i64, tpu.core_type = #tpu.core_type<tc>, window_params = [{transform_indices = @transform_0, window_bounds = array<i64: 16, 32>}, {pipeline_mode = #tpu.pipeline_mode<synchronous>, transform_indices = @transform_1, window_bounds = array<i64: 1, 32>}, {pipeline_mode = #tpu.pipeline_mode<synchronous>, transform_indices = @transform_2, window_bounds = array<i64: 1, 1>}, {transform_indices = @transform_3, window_bounds = array<i64: 16, 1>}]} {
    %c0 = arith.constant 0 : index
    %c0_0 = arith.constant 0 : index
    %0 = vector.load %arg1[%c0, %c0_0] : memref<16x32xf32, #tpu.memory_space<vmem>>, vector<16x32xf32>
    %c0_1 = arith.constant 0 : index
    %c0_2 = arith.constant 0 : index
    %1 = vector.load %arg2[%c0_1, %c0_2] : memref<1x32xf32, #tpu.memory_space<vmem>>, vector<1x32xf32>
    %2 = vector.broadcast %1 : vector<1x32xf32> to vector<16x32xf32>
    %3 = arith.mulf %0, %2 : vector<16x32xf32>
    %cst = arith.constant dense<0.000000e+00> : vector<16xf32>
    %4 = vector.multi_reduction <add>, %3, %cst [1] : vector<16x32xf32> to vector<16xf32>
    %5 = vector.shape_cast %4 : vector<16xf32> to vector<16x1xf32>
    %c0_3 = arith.constant 0 : index
    %c0_4 = arith.constant 0 : index
    %6 = vector.load %arg3[%c0_3, %c0_4] : memref<1x1xf32, #tpu.memory_space<vmem>>, vector<1x1xf32>
    %7 = vector.broadcast %6 : vector<1x1xf32> to vector<16x1xf32>
    %8 = arith.addf %5, %7 : vector<16x1xf32>
    %c0_5 = arith.constant 0 : index
    %c0_6 = arith.constant 0 : index
    %9 = vector.load %arg4[%c0_5, %c0_6] : memref<16x1xf32, #tpu.memory_space<vmem>>, vector<16x1xf32>
    tpu.vector_store %arg4[%c0_5, %c0_6], %8 {strides = array<i32>} : memref<16x1xf32, #tpu.memory_space<vmem>>, vector<16x1xf32>,
    return
  }
  func.func @transform_0(%arg0: i32) -> (i32, i32) {
    %c0_i32 = arith.constant 0 : i32
    %c0_i32_0 = arith.constant 0 : i32
    return %arg0, %c0_i32 : i32, i32
  }
  func.func @transform_1(%arg0: i32) -> (i32, i32) {
    %c0_i32 = arith.constant 0 : i32
    %c0_i32_0 = arith.constant 0 : i32
    %c0_i32_1 = arith.constant 0 : i32
    return %c0_i32, %c0_i32_0 : i32, i32
  }
  func.func @transform_2(%arg0: i32) -> (i32, i32) {
    %c0_i32 = arith.constant 0 : i32
    %c0_i32_0 = arith.constant 0 : i32
    %c0_i32_1 = arith.constant 0 : i32
    return %c0_i32, %c0_i32_0 : i32, i32
  }
  func.func @transform_3(%arg0: i32) -> (i32, i32) {
    %c0_i32 = arith.constant 0 : i32
    %c0_i32_0 = arith.constant 0 : i32
    return %arg0, %c0_i32 : i32, i32
  }
}

</mosaic_0001>

<bundles_post_ra>
// kernel: tpu_custom_call.1
= control target key start
LH: loop header
LB: loop body
LE: loop exit
PB: predicated region body
PF: predicated region fallthrough
CT: control target
= control target key end

     0   :  { %s141_s0 = inlined_call_operand.hbm [shape: f32[16,32], index: 0, kind: input, shape index: {}]   ;;  %s142_s1 = inlined_call_operand.vmem [shape: f32[1,32], index: 1, kind: input, shape index: {}]   ;;  %s143_s2 = inlined_call_operand.<no memory space> [shape: f32[1,1], index: 2, kind: input, shape index: {}]   ;;  %s144_s3 = inlined_call_operand.vmem [shape: f32[16,1], index: 3, kind: output, shape index: {}]  }
   0x1   :  { %v8_v0 = vstv %s143_s2 }
   0x2   :  { %9 = vst [vmem:[#allocation2] sm:$0x1] %v8_v0 }
   0x3   :  { %10 = vsyncpa [#allocation4], 0  ;;  %s94_s14 = smov [#allocation3]   ;;  %s70_s18 = scalar_lea.hbm %s141_s0, 256 }
   0x4   :  { %s16_s15 = sshll.u32 %s94_s14, 4  ;;  %p71_p0 = scmp.ne.s32.totalorder %s141_s0, %s70_s18  ;;  %s17_s15 = int_to_ptr.vmem [resolvable:$true] %s16_s15 }
   0x5   :  { %p74_p1 = scmp.lt.u32.totalorder %s70_s18, %s141_s0 }
   0x7   :  { %p76_p2 = pnand %p74_p1, %p71_p0 }
   0x9   :  { %79 = shalt.err (!%p76_p2)
}
   0xa   :  { %s80_s2 = scalar_lea.vmem %s17_s15, 256  ;;  %p85_p4 = scmp.lt.s32.totalorder %s17_s15, %s17_s15 }
   0xb   :  { %p81_p3 = scmp.ne.s32.totalorder %s17_s15, %s80_s2  ;;  %p86_p5 = scmp.lt.s32.totalorder %s80_s2, %s80_s2 }
   0xd   :  { %p87_p6 = por %p86_p5, %p85_p4 }
   0xf   :  { %p88_p7 = pnand %p87_p6, %p81_p3 }
  0x11   :  { %91 = shalt.err (!%p88_p7)
}
  0x12   :  { %s95_s23 = smov 128   ;;  %s96_s24 = smov 8  }
  0x13   :  { %22 = dma.hbm_to_vmem [thread:$0]  %s141_s0, 256, %s17_s15, [#allocation4], %s95_s23, %s95_s23, %s96_s24  }
  0x14   :  { %92 = dma.done.wait [#allocation4], 256  }
  0x15   :  { %93 = vsyncadd [#allocation4], 4294967040  ;;  %v30_v1 = vld [vmem:[#allocation3] sm:$0xff]  ;;  %v65_v2 = vld [vmem:[%s142_s1] ss:$0 sm:$0xff]  ;;  %vm41_vm0 = vcmask 261120  }
  0x16   :  { %v31_v3 = vld [vmem:[#allocation3 + $0x8] sm:$0xff]  ;;  %v39_v4 = vmul.f32 %v65_v2, %v30_v1  ;;  %v66_v8 = vld [vmem:[#allocation2] ss:$0 sm:$0xff]  ;;  %vm57_vm1 = vcmask 7168  }
  0x17   :  { %v40_v5 = vmul.f32 %v65_v2, %v31_v3 }
  0x18   :  { %v42_v6 = vsel %vm41_vm0, %v39_v4, 0.0 }
  0x19   :  { %43 = vadd.xlane.f32.xlu0 %v42_v6  ;;  %v45_v7 = vsel %vm41_vm0, %v40_v5, 0.0 }
  0x1d   :  { %46 = vadd.xlane.f32.xlu0 %v45_v7 }
  0xa6   :  { %v44_v9 = vpop.xlane.xlu0 %43 }
  0xa7   :  { %v55_v10 = vadd.f32 %v66_v8, %v44_v9 }
  0xa9   :  { %58 = vst.msk [vmem:[%s144_s3] sm:$0xff] %vm57_vm1, %v55_v10 }
  0xaa   :  { %v47_v11 = vpop.xlane.xlu0 %46 }
  0xab   :  { %v56_v12 = vadd.f32 %v66_v8, %v47_v11 }
  0xad   :  { %59 = vst.msk [vmem:[%s144_s3 + $0x8] sm:$0xff] %vm57_vm1, %v56_v12 }
  0xae   :  { %64 = vsyncpa [#allocation4], 1 }

</bundles_post_ra>
